<compile_context>
chip_gen: v7x
topology: tpu7x:2x2x1
jax: 0.10.0
libtpu: 0.0.40
codegen_flags: <defaults>
</compile_context>

<pallas_src>
import functools
import math

import jax
import jax.numpy as jnp
from jax import lax
from jax.experimental import pallas as pl
from jax.experimental.pallas import tpu as pltpu


# ------------------------------------------------------------------ kernels
def _epilogue(acc_f32, b_ref, o_ref, scale_c, bias_c, fused):
    out = acc_f32 * scale_c + b_ref[...].astype(jnp.float32) * bias_c
    if fused:
        # sqrt(2) already folded into scale_c / bias_c.
        out = jnp.where(out >= 0.0, out, 0.2 * out)
    o_ref[...] = out.astype(o_ref.dtype)


def _equal_linear_kernel_noacc(x_ref, w_ref, b_ref, o_ref, *,
                               scale_c, bias_c, fused):
    """Single-K-step kernel: no reduction grid axis, no accumulator scratch.

    x_ref: (tm, K)   w_ref: (tn, K)   b_ref: (1, tn)   o_ref: (tm, tn)
    """
    acc = lax.dot_general(
        x_ref[...], w_ref[...],
        dimension_numbers=(((1,), (1,)), ((), ())),   # contract K vs K
        preferred_element_type=jnp.float32)
    _epilogue(acc, b_ref, o_ref, scale_c, bias_c, fused)


def _equal_linear_kernel_acc(x_ref, w_ref, b_ref, o_ref, acc_ref, *,
                             scale_c, bias_c, fused):
    """Tiled kernel with K as the last (reduction) grid axis.

    x_ref: (tm, tk)   w_ref: (tn, tk)   b_ref: (1, tn)
    o_ref: (tm, tn)   acc_ref: (tm, tn) f32 scratch
    """
    k = pl.program_id(2)

    @pl.when(k == 0)
    def _():
        acc_ref[...] = jnp.zeros_like(acc_ref)

    acc_ref[...] += lax.dot_general(
        x_ref[...], w_ref[...],
        dimension_numbers=(((1,), (1,)), ((), ())),
        preferred_element_type=jnp.float32)

    @pl.when(k == pl.num_programs(2) - 1)
    def _():
        _epilogue(acc_ref[...], b_ref, o_ref, scale_c, bias_c, fused)


# ------------------------------------------------------------------ wrapper
def _round_up(x, m):
    return ((x + m - 1) // m) * m


def _pick_tile(dim, max_full, candidates):
    """Full dim if small enough (no padding); else the candidate tile that
    minimizes round-up waste (ties -> larger tile, candidates sorted desc)."""
    if dim <= max_full:
        return dim
    best, best_waste = None, None
    for c in candidates:
        waste = (-dim) % c
        if best is None or waste < best_waste:
            best, best_waste = c, waste
    return best


def equal_linear(x, weight, bias=None, *, lr_mul=1.0, activation=None):
    """EqualLinear forward.

    x:      (..., in_dim)
    weight: (out_dim, in_dim)   (native PyTorch F.linear layout — NOT transposed)
    bias:   (out_dim,) or None
    """
    orig_shape = x.shape
    K = orig_shape[-1]
    x2 = x.reshape(-1, K)
    M = x2.shape[0]
    N, in_dim = weight.shape
    assert in_dim == K, "weight/in_dim mismatch"

    scale = (1.0 / math.sqrt(K)) * lr_mul
    fused = activation is not None
    if fused:
        s2 = math.sqrt(2.0)
        scale_c, bias_c = scale * s2, lr_mul * s2     # fold sqrt(2) into consts
    else:
        scale_c, bias_c = scale, lr_mul

    if bias is None:
        bias = jnp.zeros((N,), dtype=x.dtype)

    # ---- tile selection (lane-dense, (8,128)-safe, waste-minimizing) ----
    tm = _pick_tile(M, 512, (512, 256, 128))          # multiples of 8 / full M
    tn = _pick_tile(N, 512, (512, 256, 128))          # multiples of 128 / full N
    tk = _pick_tile(K, 1024, (1024, 512, 256))        # multiples of 128 / full K

    Mp, Np, Kp = _round_up(M, tm), _round_up(N, tn), _round_up(K, tk)

    # Tiny-problem case with one output block: split N across both TensorCores
    # (v7x) when the halves stay 128-lane aligned.
    if Mp // tm == 1 and Np // tn == 1 and tn == N and N % 256 == 0:
        tn = N // 2

    # ---- pad only when actually required (zero-pad of K is exact) ----
    x_p = x2
    if Mp != M or Kp != K:
        x_p = jnp.pad(x2, ((0, Mp - M), (0, Kp - K)))
    w_p = weight
    if Np != N or Kp != K:
        w_p = jnp.pad(weight, ((0, Np - N), (0, Kp - K)))
    b_p = bias.reshape(1, N)
    if Np != N:
        b_p = jnp.pad(b_p, ((0, 0), (0, Np - N)))

    n_m, n_n, n_k = Mp // tm, Np // tn, Kp // tk

    itemsize = x2.dtype.itemsize
    cost = pl.CostEstimate(
        flops=2 * M * N * K,
        transcendentals=0,
        bytes_accessed=itemsize * (M * K + K * N + M * N))

    if n_k == 1:
        # Fast path: whole K in one block -> no K loop, no accumulator scratch.
        kernel = functools.partial(_equal_linear_kernel_noacc,
                                   scale_c=scale_c, bias_c=bias_c, fused=fused)
        out_p = pl.pallas_call(
            kernel,
            out_shape=jax.ShapeDtypeStruct((Mp, Np), x.dtype),
            grid_spec=pltpu.PrefetchScalarGridSpec(
                num_scalar_prefetch=0,
                grid=(n_m, n_n),
                in_specs=[
                    pl.BlockSpec((tm, Kp), lambda i, j: (i, 0)),   # x tile
                    pl.BlockSpec((tn, Kp), lambda i, j: (j, 0)),   # W tile (N,K)
                    pl.BlockSpec((1, tn), lambda i, j: (0, j)),    # bias tile
                ],
                out_specs=pl.BlockSpec((tm, tn), lambda i, j: (i, j)),
            ),
            compiler_params=pltpu.CompilerParams(
                dimension_semantics=("parallel", "parallel"),
                vmem_limit_bytes=32 * 1024 * 1024),
            cost_estimate=cost,
        )(x_p, w_p, b_p)
    else:
        kernel = functools.partial(_equal_linear_kernel_acc,
                                   scale_c=scale_c, bias_c=bias_c, fused=fused)
        out_p = pl.pallas_call(
            kernel,
            out_shape=jax.ShapeDtypeStruct((Mp, Np), x.dtype),
            grid_spec=pltpu.PrefetchScalarGridSpec(
                num_scalar_prefetch=0,
                grid=(n_m, n_n, n_k),
                in_specs=[
                    pl.BlockSpec((tm, tk), lambda i, j, k: (i, k)),  # x tile
                    pl.BlockSpec((tn, tk), lambda i, j, k: (j, k)),  # W tile (N,K)
                    pl.BlockSpec((1, tn), lambda i, j, k: (0, j)),   # bias tile
                ],
                out_specs=pl.BlockSpec((tm, tn), lambda i, j, k: (i, j)),
                scratch_shapes=[pltpu.VMEM((tm, tn), jnp.float32)],
            ),
            compiler_params=pltpu.CompilerParams(
                dimension_semantics=("parallel", "parallel", "arbitrary"),
                vmem_limit_bytes=32 * 1024 * 1024),
            cost_estimate=cost,
        )(x_p, w_p, b_p)

    out = out_p
    if Mp != M or Np != N:
        out = out_p[:M, :N]
    return out.reshape(orig_shape[:-1] + (N,))


# ------------------------------------------------------------------ test
def _reference(x, weight, bias, lr_mul, activation):
    K = x.shape[-1]
    scale = (1.0 / math.sqrt(K)) * lr_mul
    pre = jnp.dot(x, (weight * scale).T, precision=lax.Precision.HIGHEST)
    pre = pre + bias * lr_mul
    if activation is not None:
        pre = jnp.where(pre >= 0, pre, 0.2 * pre) * math.sqrt(2.0)
    return pre


def _run_case(key, M, K, N, lr_mul, bias_init, activation):
    k_x, k_w = jax.random.split(key)
    x = jax.random.normal(k_x, (M, K), dtype=jnp.float32)
    # nn.Parameter(torch.randn(out_dim, in_dim).div_(lr_mul))
    weight = jax.random.normal(k_w, (N, K), dtype=jnp.float32) / lr_mul
    bias = jnp.full((N,), bias_init, dtype=jnp.float32)

    out = equal_linear(x, weight, bias, lr_mul=lr_mul, activation=activation)
    jax.block_until_ready(out)
    ref = _reference(x, weight, bias, lr_mul, activation)

    assert out.shape == (M, N)
    # Tolerance covers MXU f32-matmul pass-count differences vs the HIGHEST-
    # precision reference; structural bugs would be orders of magnitude larger.
    assert jnp.allclose(out, ref, atol=2e-2, rtol=2e-2), (M, K, N, activation)


if __name__ == "__main__":
    key = jax.random.PRNGKey(0)
    keys = jax.random.split(key, 3)

    # Small shapes consistent with the module: batch=8, in_dim=32, out_dim=64.
    _run_case(keys[0], M=8, K=32, N=64, lr_mul=0.5, bias_init=0.3,
              activation=None)
    # Mapping-net-like shape, fused leaky-ReLU path (single-K fast path,
    # N split across cores).
    _run_case(keys[1], M=16, K=512, N=512, lr_mul=0.01, bias_init=0.0,
              activation="fused_lrelu")
    # K > 1024 exercises the multi-step reduction / accumulator path.
    _run_case(keys[2], M=16, K=1280, N=384, lr_mul=1.0, bias_init=0.1,
              activation="fused_lrelu")

    print("KERNEL_OK")
</pallas_src>

<mosaic_0001>
module attributes {stable_mosaic.version = 11 : i64} {
  func.func @_equal_linear_kernel_noacc(%arg0: i32, %arg1: i32, %arg2: memref<8x32xf32, #tpu.memory_space<vmem>>, %arg3: memref<64x32xf32, #tpu.memory_space<vmem>>, %arg4: memref<1x64xf32, #tpu.memory_space<vmem>>, %arg5: memref<8x64xf32, #tpu.memory_space<vmem>>) attributes {dimension_semantics = [#tpu.dimension_semantics<parallel>, #tpu.dimension_semantics<parallel>], iteration_bounds = array<i64: 1, 1>, scalar_prefetch = 0 : i64, scratch_operands = 0 : i64, tpu.core_type = #tpu.core_type<tc>, window_params = [{transform_indices = @transform_0, window_bounds = array<i64: 8, 32>}, {transform_indices = @transform_1, window_bounds = array<i64: 64, 32>}, {transform_indices = @transform_2, window_bounds = array<i64: 1, 64>}, {transform_indices = @transform_3, window_bounds = array<i64: 8, 64>}]} {
    %c0 = arith.constant 0 : index
    %c0_0 = arith.constant 0 : index
    %0 = vector.load %arg2[%c0, %c0_0] : memref<8x32xf32, #tpu.memory_space<vmem>>, vector<8x32xf32>
    %c0_1 = arith.constant 0 : index
    %c0_2 = arith.constant 0 : index
    %1 = vector.load %arg3[%c0_1, %c0_2] : memref<64x32xf32, #tpu.memory_space<vmem>>, vector<64x32xf32>
    %cst = arith.constant dense<0.000000e+00> : vector<8x64xf32>
    %2 = tpu.matmul %0, %1, %cst {dimension_numbers = #tpu.dot_dimension_numbers<[1], [1], [0], [0], [0, 0, 1, 0], [], []>} : vector<8x32xf32>, vector<64x32xf32>, vector<8x64xf32> -> vector<8x64xf32>
    %cst_3 = arith.constant 0.0883883461 : f32
    %3 = vector.broadcast %cst_3 : f32 to vector<8x64xf32>
    %4 = arith.mulf %2, %3 : vector<8x64xf32>
    %c0_4 = arith.constant 0 : index
    %c0_5 = arith.constant 0 : index
    %5 = vector.load %arg4[%c0_4, %c0_5] : memref<1x64xf32, #tpu.memory_space<vmem>>, vector<1x64xf32>
    %cst_6 = arith.constant 5.000000e-01 : f32
    %6 = vector.broadcast %cst_6 : f32 to vector<1x64xf32>
    %7 = arith.mulf %5, %6 : vector<1x64xf32>
    %8 = vector.broadcast %7 : vector<1x64xf32> to vector<8x64xf32>
    %9 = arith.addf %4, %8 : vector<8x64xf32>
    %c0_7 = arith.constant 0 : index
    %c0_8 = arith.constant 0 : index
    %10 = vector.load %arg5[%c0_7, %c0_8] : memref<8x64xf32, #tpu.memory_space<vmem>>, vector<8x64xf32>
    tpu.vector_store %arg5[%c0_7, %c0_8], %9 {strides = array<i32>} : memref<8x64xf32, #tpu.memory_space<vmem>>, vector<8x64xf32>,
    return
  }
  func.func @transform_0(%arg0: i32, %arg1: i32) -> (i32, i32) {
    %c0_i32 = arith.constant 0 : i32
    %c0_i32_0 = arith.constant 0 : i32
    return %arg0, %c0_i32 : i32, i32
  }
  func.func @transform_1(%arg0: i32, %arg1: i32) -> (i32, i32) {
    %c0_i32 = arith.constant 0 : i32
    %c0_i32_0 = arith.constant 0 : i32
    return %arg1, %c0_i32 : i32, i32
  }
  func.func @transform_2(%arg0: i32, %arg1: i32) -> (i32, i32) {
    %c0_i32 = arith.constant 0 : i32
    %c0_i32_0 = arith.constant 0 : i32
    return %c0_i32, %arg1 : i32, i32
  }
  func.func @transform_3(%arg0: i32, %arg1: i32) -> (i32, i32) {
    %c0_i32 = arith.constant 0 : i32
    return %arg0, %arg1 : i32, i32
  }
}

</mosaic_0001>

<bundles_post_ra>
// kernel: tpu_custom_call.1
= control target key start
LH: loop header
LB: loop body
LE: loop exit
PB: predicated region body
PF: predicated region fallthrough
CT: control target
= control target key end

     0   :  { %vm24_vm0 = vcmask 261120   ;;  %v229_v2 = vmov 0.0|0.0   ;;  %vm230_vm2 = vmmov 0   ;;  %v231_v5 = vmov 0.0   ;;  %s310_s0 = inlined_call_operand.vmem [shape: f32[8,32], index: 0, kind: input, shape index: {}]   ;;  %s311_s1 = inlined_call_operand.vmem [shape: f32[64,32], index: 1, kind: input, shape index: {}]   ;;  %s312_s2 = inlined_call_operand.vmem [shape: f32[1,64], index: 2, kind: input, shape index: {}]   ;;  %s313_s3 = inlined_call_operand.hbm [shape: f32[8,64], index: 3, kind: output, shape index: {}]  }
   0x1   :  { %v16_v0 = vld [vmem:[%s311_s1] sm:$0xff]  ;;  %v17_v1 = vld [vmem:[%s311_s1 + $0x8] sm:$0xff]  ;;  %185 = vmatprep.subr.bf16.mxu0 %v229_v2  ;;  %vm261_vm1 = vmpackc.low %vm24_vm0, %vm24_vm0  ;;  %182 = vmatprep.mubr.msk.f32.mxu0 %vm230_vm2, %v231_v5 }
   0x2   :  { %v186_v3 = vpack.c.bf16 %v17_v1, %v16_v0 }
   0x4   :  { %188 = vmatpush3.bf16.xpose.msk.msra.mxu0 %vm261_vm1, %v186_v3 }
   0x5   :  { %8 = vsyncpa [#allocation3], 0  ;;  %189 = vmatprep.subr.bf16.mxu0 %v229_v2  ;;  %v18_v6 = vld [vmem:[%s311_s1 + $0x10] sm:$0xff]  ;;  %v19_v7 = vld [vmem:[%s311_s1 + $0x18] sm:$0xff]  ;;  %v126_v16 = vlaneseq  ;;  %vm132_vm3 = vcmask 523264  }
   0x6   :  { %v190_v8 = vpack.c.bf16 %v19_v7, %v18_v6  ;;  %v20_v9 = vld [vmem:[%s311_s1 + $0x20] sm:$0xff]  ;;  %v21_v10 = vld [vmem:[%s311_s1 + $0x28] sm:$0xff]  ;;  %v22_v12 = vld [vmem:[%s311_s1 + $0x30] sm:$0xff] }
   0x7   :  { %v194_v11 = vpack.c.bf16 %v21_v10, %v20_v9  ;;  %v23_v13 = vld [vmem:[%s311_s1 + $0x38] sm:$0xff]  ;;  %v15_v15 = vld [vmem:[%s310_s0] sm:$0xff]  ;;  %v127_v17 = vshrl.u32 %v126_v16, 7  ;;  %s232_s1 = smov [#allocation2]  }
   0x8   :  { %v198_v14 = vpack.c.bf16 %v23_v13, %v22_v12  ;;  %v123_v18 = vld [vmem:[%s312_s2] sm:$0x1]  ;;  %s140_s5 = sshll.u32 %s232_s1, 4  ;;  %s141_s5 = int_to_ptr.vmem [resolvable:$true] %s140_s5 }
   0x9   :  { %v124_v19 = vmul.f32 0.5, %v123_v18  ;;  %v128_v20 = vsub.s32 0, %v127_v17  ;;  %s205_s0 = scalar_lea.vmem %s141_s5, 128  ;;  %p210_p1 = scmp.lt.s32.totalorder %s141_s5, %s141_s5 }
   0xa   :  { %p206_p0 = scmp.ne.s32.totalorder %s141_s5, %s205_s0  ;;  %p211_p2 = scmp.lt.s32.totalorder %s205_s0, %s205_s0 }
   0xb   :  { %v129_v21 = vrot.slane %v124_v19, %v128_v20 }
   0xc   :  { %192 = vmatpush3.bf16.xpose.msk.msra.mxu0 %vm261_vm1, %v190_v8  ;;  %p212_p3 = por %p211_p2, %p210_p1 }
   0xd   :  { %193 = vmatprep.subr.bf16.mxu0 %v229_v2 }
   0xe   :  { %p213_p4 = pnand %p212_p3, %p206_p0 }
  0x14   :  { %196 = vmatpush3.bf16.xpose.msk.msra.mxu0 %vm261_vm1, %v194_v11 }
  0x15   :  { %197 = vmatprep.subr.bf16.mxu0 %v229_v2 }
  0x1c   :  { %200 = vmatpush3.bf16.xpose.msk.msra.mxu0 %vm261_vm1, %v198_v14 }
  0x23   :  { %183 = vmatmul.mubr.msk.f32.vlgmr.msra.gmra.mrb[0].mxu0 %vm24_vm0, %v15_v15 }
  0xf6   :  { %v118_v22 = vpop.f32.mrb[0].mxu0 }
  0xf7   :  { %v122_v23 = vmul.f32 0.088388346, %v118_v22  ;;  %v184_v24 = vpop.f32.mrb[1].mxu0 }
  0xf9   :  { %v131_v25 = vadd.f32 %v129_v21, %v122_v23 }
  0xfb   :  { %133 = vst.msk [vmem:[#allocation2] sm:$0xff] %vm132_vm3, %v131_v25 }
  0xfc   :  { %216 = shalt.err (!%p213_p4)
}
  0xfd   :  { %s217_s7 = scalar_lea.hbm %s313_s3, 128 }
  0xfe   :  { %p218_p5 = scmp.ne.s32.totalorder %s313_s3, %s217_s7  ;;  %p221_p6 = scmp.lt.u32.totalorder %s217_s7, %s313_s3 }
 0x100   :  { %p223_p7 = pnand %p221_p6, %p218_p5 }
 0x102   :  { %226 = shalt.err (!%p223_p7)
}
 0x103   :  { %143 = dma.vmem_to_hbm [thread:$0]  %s141_s5, 128, %s313_s3, [#allocation3]  }
 0x104   :  { %227 = dma.done.wait [#allocation3], 128  }
 0x105   :  { %228 = vsyncadd [#allocation3], 4294967168 }
 0x106   :  { %147 = vsyncpa [#allocation3], 1 }

</bundles_post_ra>
